<compile_context>
chip_gen: v7x
topology: tpu7x:2x2x1
jax: 0.10.0
libtpu: 0.0.40
codegen_flags: <defaults>
</compile_context>

<pallas_src>
import math
import numpy as np
import jax
import jax.numpy as jnp
from jax.experimental import pallas as pl
from jax.experimental.pallas import tpu as pltpu

ALL_DIRECTIONS = frozenset({"left", "right", "top", "bottom"})


# ----------------------------------------------------------------------------
# Host-side stencil setup: per-direction lane shift + (mask * 1/deg) row.
# Lane axis of length N = tb * V holds tb batch segments of V vertices each.
# ----------------------------------------------------------------------------
def build_stencil(size_x, size_y, tb, directions=ALL_DIRECTIONS):
    V = size_x * size_y
    N = tb * V
    i = np.arange(V) // size_y
    j = np.arange(V) % size_y

    deg = np.zeros(V, np.float32)
    masks, shifts = [], []
    if "top" in directions:       # neighbour (i-1, j): value at lane v - size_y
        m = (i >= 1).astype(np.float32); deg += m
        masks.append(m); shifts.append(size_y)
    if "bottom" in directions:    # neighbour (i+1, j): value at lane v + size_y
        m = (i <= size_x - 2).astype(np.float32); deg += m
        masks.append(m); shifts.append(N - size_y)
    if "left" in directions:      # neighbour (i, j-1): value at lane v - 1
        m = (j >= 1).astype(np.float32); deg += m
        masks.append(m); shifts.append(1)
    if "right" in directions:     # neighbour (i, j+1): value at lane v + 1
        m = (j <= size_y - 2).astype(np.float32); deg += m
        masks.append(m); shifts.append(N - 1)

    inv_deg = 1.0 / np.maximum(deg, 1.0)
    mult = np.stack([m * inv_deg for m in masks], 0)   # [n_dirs, V]
    mult = np.tile(mult, (1, tb))                      # [n_dirs, N]
    return jnp.asarray(mult, dtype=jnp.float32), tuple(int(s) for s in shifts)


def _choose_batch_tile(B, V, target_lanes=1024):
    """Divisor of B: widen lanes toward target_lanes, keep >=2 grid steps
    when possible (v7x megacore), and respect the 128-lane block rule."""
    divisors = [d for d in range(1, B + 1) if B % d == 0]
    ok = [d for d in divisors if d == B or (d * V) % 128 == 0]
    two_step = [d for d in ok if B // d >= 2]
    pool = two_step if two_step else ok
    fit = [d for d in pool if d * V <= target_lanes]
    return max(fit) if fit else min(pool)


def _vmem_limit_bytes(Fin, Fout, K, n_dirs, n_lanes):
    f32 = 4
    live = (
        2 * Fin * n_lanes * f32          # x block (double buffered)
        + 2 * Fout * n_lanes * f32       # out block (double buffered)
        + n_dirs * n_lanes * f32         # stencil multipliers
        + K * Fin * n_lanes * f32        # Chebyshev-term scratch
        + (3 * Fin + 2 * Fout) * n_lanes * f32   # recurrence temps + f32 acc
        + Fout * K * Fin * 2 + Fout * f32        # weights (bf16) + bias
    )
    # generous headroom for compiler temps; cap at v7x physical VMEM (64 MiB)
    return int(min(max(4 * live, 4 << 20), 64 << 20))


# ----------------------------------------------------------------------------
# Fused Pallas kernel: Chebyshev recurrence (stencil L) + single projection.
# ----------------------------------------------------------------------------
def make_fused_kernel(K, shifts):
    n_dirs = len(shifts)

    def kernel(x_ref, w_ref, b_ref, m_ref, o_ref, t_ref):
        # x_ref : [Fin, N]       N = TB*V lanes (batch packed on lanes)
        # w_ref : [Fout, K*Fin]  bf16, Chebyshev orders flattened into columns
        # b_ref : [Fout, 1]      f32 bias
        # m_ref : [n_dirs, N]    boundary_mask * 1/deg per direction (f32)
        # o_ref : [Fout, N]
        # t_ref : [K*Fin, N]     f32 VMEM scratch holding all Chebyshev terms
        Fin = x_ref.shape[0]
        x = x_ref[...].astype(jnp.float32)
        m = m_ref[...]

        def apply_L(t):
            # L @ t with L = D^{-1} A as a 4-point stencil: one XLU roll plus
            # one VPU multiply-add per direction (mask & 1/deg pre-folded).
            acc = pltpu.roll(t, shifts[0], axis=1) * m[0:1]
            for d in range(1, n_dirs):
                acc = acc + pltpu.roll(t, shifts[d], axis=1) * m[d:d + 1]
            return acc

        t_ref[pl.ds(0, Fin), :] = x
        if K > 1:
            t_prev, t_cur = x, apply_L(x)
            t_ref[pl.ds(Fin, Fin), :] = t_cur
            for k in range(2, K):
                t_next = 2.0 * apply_L(t_cur) - t_prev
                t_ref[pl.ds(k * Fin, Fin), :] = t_next
                t_prev, t_cur = t_cur, t_next

        # One wide MXU pass: [Fout, K*Fin] @ [K*Fin, N], bf16 in / f32 acc.
        t_all = t_ref[...].astype(jnp.bfloat16)
        acc = jnp.dot(w_ref[...], t_all, preferred_element_type=jnp.float32)
        o_ref[...] = (acc + b_ref[...]).astype(o_ref.dtype)

    return kernel


def fused_grid_graph_conv(x, weight, bias, size_x, size_y,
                          directions=ALL_DIRECTIONS):
    """x: [B, Fin, V]; weight: [Fin, K, Fout]; bias: [Fout] -> [B, Fout, V]."""
    B, Fin, V = x.shape
    assert V == size_x * size_y, (V, size_x, size_y)
    _, K, Fout = weight.shape
    assert K >= 1

    tb = _choose_batch_tile(B, V)
    n_lanes = tb * V
    n_steps = B // tb

    mult, shifts = build_stencil(size_x, size_y, tb, directions)
    n_dirs = mult.shape[0]
    assert n_dirs >= 1 or K == 1, "empty direction set with K>1"

    # Wrapper-side layout plumbing (single transpose each way; no dtype
    # materialization — the kernel casts in VMEM).
    x2d = jnp.transpose(x, (1, 0, 2)).reshape(Fin, B * V)            # [Fin, B*V]
    w_flat = (jnp.transpose(weight, (2, 1, 0))
              .reshape(Fout, K * Fin).astype(jnp.bfloat16))          # [Fout, K*Fin]
    b2 = bias.reshape(Fout, 1).astype(jnp.float32)

    kernel = make_fused_kernel(K, shifts)
    out2d = pl.pallas_call(
        kernel,
        out_shape=jax.ShapeDtypeStruct((Fout, B * V), jnp.float32),
        grid_spec=pltpu.PrefetchScalarGridSpec(
            num_scalar_prefetch=0,
            grid=(n_steps,),
            in_specs=[
                pl.BlockSpec((Fin, n_lanes), lambda i: (0, i)),
                pl.BlockSpec((Fout, K * Fin), lambda i: (0, 0)),
                pl.BlockSpec((Fout, 1), lambda i: (0, 0)),
                pl.BlockSpec((n_dirs, n_lanes), lambda i: (0, 0)),
            ],
            out_specs=pl.BlockSpec((Fout, n_lanes), lambda i: (0, i)),
            scratch_shapes=[pltpu.VMEM((K * Fin, n_lanes), jnp.float32)],
        ),
        compiler_params=pltpu.CompilerParams(
            dimension_semantics=("parallel",),
            vmem_limit_bytes=_vmem_limit_bytes(Fin, Fout, K, n_dirs, n_lanes),
        ),
    )(x2d, w_flat, b2, mult)

    return jnp.transpose(out2d.reshape(Fout, B, V), (1, 0, 2))       # [B, Fout, V]


# ----------------------------------------------------------------------------
# GridGraphConv forward (same filters on every sub-graph).
# ----------------------------------------------------------------------------
def grid_graph_conv_forward(x, weight, bias, size_x, size_y,
                            underlying_graphs=None, merge_way="mean"):
    """x: [B, C_in, V] -> [B, C_out, V]."""
    if underlying_graphs is None:
        underlying_graphs = [ALL_DIRECTIONS]
    assert merge_way in ("mean", "cat")
    # TODO(synk): same_filters=False (independent weights per sub-graph) not implemented.
    outs = [fused_grid_graph_conv(x, weight, bias, size_x, size_y, d)
            for d in underlying_graphs]
    if len(outs) == 1:        # default config: mean over one graph == identity
        return outs[0]
    if merge_way == "mean":
        return jnp.mean(jnp.stack(outs, axis=0), axis=0)
    return jnp.concatenate(outs, axis=1)


# ----------------------------------------------------------------------------
# Pure-JAX reference with the dense random-walk operator (correctness check).
# ----------------------------------------------------------------------------
def dense_random_walk(size_x, size_y, directions=ALL_DIRECTIONS):
    V = size_x * size_y
    A = np.zeros((V, V), dtype=np.float32)
    offs = {"top": (-1, 0), "bottom": (1, 0), "left": (0, -1), "right": (0, 1)}
    for i in range(size_x):
        for j in range(size_y):
            for name, (di, dj) in offs.items():
                if name not in directions:
                    continue
                ni, nj = i + di, j + dj
                if 0 <= ni < size_x and 0 <= nj < size_y:
                    A[i * size_y + j, ni * size_y + nj] = 1.0
    d = np.maximum(A.sum(axis=1), 1.0)
    return jnp.asarray(A / d[:, None])


def reference_forward(x, weight, bias, size_x, size_y,
                      underlying_graphs=None, merge_way="mean"):
    if underlying_graphs is None:
        underlying_graphs = [ALL_DIRECTIONS]
    B, Fin, V = x.shape
    _, K, Fout = weight.shape
    x_bvf = jnp.transpose(x, (0, 2, 1))
    outs = []
    for dirs in underlying_graphs:
        L = dense_random_walk(size_x, size_y, dirs)
        x0 = jnp.transpose(x_bvf, (1, 2, 0)).reshape(V, Fin * B)
        terms = [x0]
        if K > 1:
            x1 = L @ x0
            terms.append(x1)
            for _ in range(2, K):
                x2 = 2.0 * (L @ x1) - x0
                terms.append(x2)
                x0, x1 = x1, x2
        xc = jnp.stack(terms, 0).reshape(K, V, Fin, B)
        xc = jnp.transpose(xc, (3, 1, 2, 0)).reshape(B * V, Fin * K)
        o = xc @ weight.reshape(Fin * K, Fout) + bias
        outs.append(o.reshape(B, V, Fout))
    if merge_way == "mean":
        out = jnp.mean(jnp.stack(outs, 0), 0)
    else:
        out = jnp.concatenate(outs, -1)
    return jnp.transpose(out, (0, 2, 1))


if __name__ == "__main__":
    # Small config: in_channels=4, out_channels=8, kernel_size=3, grid 16x16.
    B, Cin, Cout, K = 2, 4, 8, 3
    size_x = size_y = 16
    V = size_x * size_y

    key = jax.random.PRNGKey(0)
    kx, kw, kb = jax.random.split(key, 3)

    x = jax.random.normal(kx, (B, Cin, V), dtype=jnp.float32)

    # GraphConv.reset_parameters: normal(0, std), std = 1/sqrt(Cin*(K+0.5)/2).
    std = 1.0 / math.sqrt(Cin * (K + 0.5) / 2.0)
    weight = std * jax.random.normal(kw, (Cin, K, Cout), dtype=jnp.float32)
    bias = 0.1 * jax.random.normal(kb, (Cout,), dtype=jnp.float32)

    out = grid_graph_conv_forward(x, weight, bias, size_x, size_y)
    out = jax.block_until_ready(out)
    assert out.shape == (B, Cout, V), out.shape

    ref = reference_forward(x, weight, bias, size_x, size_y)
    # bf16 MXU operands (f32 accumulation) -> slightly looser tolerance.
    np.testing.assert_allclose(np.asarray(out), np.asarray(ref),
                               rtol=5e-2, atol=5e-2)

    print("KERNEL_OK")
</pallas_src>

<mosaic_0001>
module attributes {stable_mosaic.version = 11 : i64} {
  func.func @kernel(%arg0: i32, %arg1: memref<4x256xf32, #tpu.memory_space<vmem>>, %arg2: memref<8x12xbf16, #tpu.memory_space<vmem>>, %arg3: memref<8x1xf32, #tpu.memory_space<vmem>>, %arg4: memref<4x256xf32, #tpu.memory_space<vmem>>, %arg5: memref<8x256xf32, #tpu.memory_space<vmem>>, %arg6: memref<12x256xf32, #tpu.memory_space<vmem>>) attributes {dimension_semantics = [#tpu.dimension_semantics<parallel>], iteration_bounds = array<i64: 2>, scalar_prefetch = 0 : i64, scratch_operands = 1 : i64, tpu.core_type = #tpu.core_type<tc>, window_params = [{transform_indices = @transform_0, window_bounds = array<i64: 4, 256>}, {pipeline_mode = #tpu.pipeline_mode<synchronous>, transform_indices = @transform_1, window_bounds = array<i64: 8, 12>}, {pipeline_mode = #tpu.pipeline_mode<synchronous>, transform_indices = @transform_2, window_bounds = array<i64: 8, 1>}, {pipeline_mode = #tpu.pipeline_mode<synchronous>, transform_indices = @transform_3, window_bounds = array<i64: 4, 256>}, {transform_indices = @transform_4, window_bounds = array<i64: 8, 256>}]} {
    %c0 = arith.constant 0 : index
    %c0_0 = arith.constant 0 : index
    %0 = vector.load %arg1[%c0, %c0_0] : memref<4x256xf32, #tpu.memory_space<vmem>>, vector<4x256xf32>
    %c0_1 = arith.constant 0 : index
    %c0_2 = arith.constant 0 : index
    %1 = vector.load %arg4[%c0_1, %c0_2] : memref<4x256xf32, #tpu.memory_space<vmem>>, vector<4x256xf32>
    %c0_3 = arith.constant 0 : index
    %c0_4 = arith.constant 0 : index
    %2 = vector.load %arg6[%c0_3, %c0_4] : memref<12x256xf32, #tpu.memory_space<vmem>>, vector<4x256xf32>
    tpu.vector_store %arg6[%c0_3, %c0_4], %0 {strides = array<i32>} : memref<12x256xf32, #tpu.memory_space<vmem>>, vector<4x256xf32>,
    %c16_i32 = arith.constant 16 : i32
    %3 = tpu.dynamic_rotate %0 by %c16_i32 dim 1 : vector<4x256xf32>, i32 -> vector<4x256xf32>
    %4 = vector.extract_strided_slice %1 {offsets = [0, 0], sizes = [1, 256], strides = [1, 1]} : vector<4x256xf32> to vector<1x256xf32>
    %5 = vector.broadcast %4 : vector<1x256xf32> to vector<4x256xf32>
    %6 = arith.mulf %3, %5 : vector<4x256xf32>
    %c240_i32 = arith.constant 240 : i32
    %7 = tpu.dynamic_rotate %0 by %c240_i32 dim 1 : vector<4x256xf32>, i32 -> vector<4x256xf32>
    %8 = vector.extract_strided_slice %1 {offsets = [1, 0], sizes = [1, 256], strides = [1, 1]} : vector<4x256xf32> to vector<1x256xf32>
    %9 = vector.broadcast %8 : vector<1x256xf32> to vector<4x256xf32>
    %10 = arith.mulf %7, %9 : vector<4x256xf32>
    %11 = arith.addf %6, %10 : vector<4x256xf32>
    %c1_i32 = arith.constant 1 : i32
    %12 = tpu.dynamic_rotate %0 by %c1_i32 dim 1 : vector<4x256xf32>, i32 -> vector<4x256xf32>
    %13 = vector.extract_strided_slice %1 {offsets = [2, 0], sizes = [1, 256], strides = [1, 1]} : vector<4x256xf32> to vector<1x256xf32>
    %14 = vector.broadcast %13 : vector<1x256xf32> to vector<4x256xf32>
    %15 = arith.mulf %12, %14 : vector<4x256xf32>
    %16 = arith.addf %11, %15 : vector<4x256xf32>
    %c255_i32 = arith.constant 255 : i32
    %17 = tpu.dynamic_rotate %0 by %c255_i32 dim 1 : vector<4x256xf32>, i32 -> vector<4x256xf32>
    %18 = vector.extract_strided_slice %1 {offsets = [3, 0], sizes = [1, 256], strides = [1, 1]} : vector<4x256xf32> to vector<1x256xf32>
    %19 = vector.broadcast %18 : vector<1x256xf32> to vector<4x256xf32>
    %20 = arith.mulf %17, %19 : vector<4x256xf32>
    %21 = arith.addf %16, %20 : vector<4x256xf32>
    %c4 = arith.constant 4 : index
    %c0_5 = arith.constant 0 : index
    %22 = vector.load %arg6[%c4, %c0_5] : memref<12x256xf32, #tpu.memory_space<vmem>>, vector<4x256xf32>
    tpu.vector_store %arg6[%c4, %c0_5], %21 {strides = array<i32>} : memref<12x256xf32, #tpu.memory_space<vmem>>, vector<4x256xf32>,
    %c16_i32_6 = arith.constant 16 : i32
    %23 = tpu.dynamic_rotate %21 by %c16_i32_6 dim 1 : vector<4x256xf32>, i32 -> vector<4x256xf32>
    %24 = vector.extract_strided_slice %1 {offsets = [0, 0], sizes = [1, 256], strides = [1, 1]} : vector<4x256xf32> to vector<1x256xf32>
    %25 = vector.broadcast %24 : vector<1x256xf32> to vector<4x256xf32>
    %26 = arith.mulf %23, %25 : vector<4x256xf32>
    %c240_i32_7 = arith.constant 240 : i32
    %27 = tpu.dynamic_rotate %21 by %c240_i32_7 dim 1 : vector<4x256xf32>, i32 -> vector<4x256xf32>
    %28 = vector.extract_strided_slice %1 {offsets = [1, 0], sizes = [1, 256], strides = [1, 1]} : vector<4x256xf32> to vector<1x256xf32>
    %29 = vector.broadcast %28 : vector<1x256xf32> to vector<4x256xf32>
    %30 = arith.mulf %27, %29 : vector<4x256xf32>
    %31 = arith.addf %26, %30 : vector<4x256xf32>
    %c1_i32_8 = arith.constant 1 : i32
    %32 = tpu.dynamic_rotate %21 by %c1_i32_8 dim 1 : vector<4x256xf32>, i32 -> vector<4x256xf32>
    %33 = vector.extract_strided_slice %1 {offsets = [2, 0], sizes = [1, 256], strides = [1, 1]} : vector<4x256xf32> to vector<1x256xf32>
    %34 = vector.broadcast %33 : vector<1x256xf32> to vector<4x256xf32>
    %35 = arith.mulf %32, %34 : vector<4x256xf32>
    %36 = arith.addf %31, %35 : vector<4x256xf32>
    %c255_i32_9 = arith.constant 255 : i32
    %37 = tpu.dynamic_rotate %21 by %c255_i32_9 dim 1 : vector<4x256xf32>, i32 -> vector<4x256xf32>
    %38 = vector.extract_strided_slice %1 {offsets = [3, 0], sizes = [1, 256], strides = [1, 1]} : vector<4x256xf32> to vector<1x256xf32>
    %39 = vector.broadcast %38 : vector<1x256xf32> to vector<4x256xf32>
    %40 = arith.mulf %37, %39 : vector<4x256xf32>
    %41 = arith.addf %36, %40 : vector<4x256xf32>
    %cst = arith.constant 2.000000e+00 : f32
    %42 = vector.broadcast %cst : f32 to vector<4x256xf32>
    %43 = arith.mulf %42, %41 : vector<4x256xf32>
    %44 = arith.subf %43, %0 : vector<4x256xf32>
    %c8 = arith.constant 8 : index
    %c0_10 = arith.constant 0 : index
    %45 = vector.load %arg6[%c8, %c0_10] : memref<12x256xf32, #tpu.memory_space<vmem>>, vector<4x256xf32>
    tpu.vector_store %arg6[%c8, %c0_10], %44 {strides = array<i32>} : memref<12x256xf32, #tpu.memory_space<vmem>>, vector<4x256xf32>,
    %c0_11 = arith.constant 0 : index
    %c0_12 = arith.constant 0 : index
    %46 = vector.load %arg6[%c0_11, %c0_12] : memref<12x256xf32, #tpu.memory_space<vmem>>, vector<12x256xf32>
    %47 = arith.truncf %46 : vector<12x256xf32> to vector<12x256xbf16>
    %c0_13 = arith.constant 0 : index
    %c0_14 = arith.constant 0 : index
    %48 = vector.load %arg2[%c0_13, %c0_14] : memref<8x12xbf16, #tpu.memory_space<vmem>>, vector<8x12xbf16>
    %cst_15 = arith.constant dense<0.000000e+00> : vector<8x256xf32>
    %49 = tpu.matmul %48, %47, %cst_15 {dimension_numbers = #tpu.dot_dimension_numbers<[1], [0], [0], [1], [0, 0, 1, 1], [], []>} : vector<8x12xbf16>, vector<12x256xbf16>, vector<8x256xf32> -> vector<8x256xf32>
    %c0_16 = arith.constant 0 : index
    %c0_17 = arith.constant 0 : index
    %50 = vector.load %arg3[%c0_16, %c0_17] : memref<8x1xf32, #tpu.memory_space<vmem>>, vector<8x1xf32>
    %51 = vector.broadcast %50 : vector<8x1xf32> to vector<8x256xf32>
    %52 = arith.addf %49, %51 : vector<8x256xf32>
    %c0_18 = arith.constant 0 : index
    %c0_19 = arith.constant 0 : index
    %53 = vector.load %arg5[%c0_18, %c0_19] : memref<8x256xf32, #tpu.memory_space<vmem>>, vector<8x256xf32>
    tpu.vector_store %arg5[%c0_18, %c0_19], %52 {strides = array<i32>} : memref<8x256xf32, #tpu.memory_space<vmem>>, vector<8x256xf32>,
    return
  }
  func.func @transform_0(%arg0: i32) -> (i32, i32) {
    %c0_i32 = arith.constant 0 : i32
    %c0_i32_0 = arith.constant 0 : i32
    return %c0_i32, %arg0 : i32, i32
  }
  func.func @transform_1(%arg0: i32) -> (i32, i32) {
    %c0_i32 = arith.constant 0 : i32
    %c0_i32_0 = arith.constant 0 : i32
    %c0_i32_1 = arith.constant 0 : i32
    return %c0_i32, %c0_i32_0 : i32, i32
  }
  func.func @transform_2(%arg0: i32) -> (i32, i32) {
    %c0_i32 = arith.constant 0 : i32
    %c0_i32_0 = arith.constant 0 : i32
    %c0_i32_1 = arith.constant 0 : i32
    return %c0_i32, %c0_i32_0 : i32, i32
  }
  func.func @transform_3(%arg0: i32) -> (i32, i32) {
    %c0_i32 = arith.constant 0 : i32
    %c0_i32_0 = arith.constant 0 : i32
    %c0_i32_1 = arith.constant 0 : i32
    return %c0_i32, %c0_i32_0 : i32, i32
  }
  func.func @transform_4(%arg0: i32) -> (i32, i32) {
    %c0_i32 = arith.constant 0 : i32
    %c0_i32_0 = arith.constant 0 : i32
    return %c0_i32, %arg0 : i32, i32
  }
}

</mosaic_0001>

<bundles_post_ra>
// kernel: tpu_custom_call.1
= control target key start
LH: loop header
LB: loop body
LE: loop exit
PB: predicated region body
PF: predicated region fallthrough
CT: control target
= control target key end

     0   :  { %9 = vsyncpa [#allocation4], 0  ;;  %s1005_s0 = inlined_call_operand.hbm [shape: f32[4,512], index: 0, kind: input, shape index: {}]   ;;  %s1006_s1 = inlined_call_operand.vmem [shape: bf16[8,12], index: 1, kind: input, shape index: {}]   ;;  %s1007_s2 = inlined_call_operand.vmem [shape: f32[8,1], index: 2, kind: input, shape index: {}]   ;;  %s1008_s3 = inlined_call_operand.vmem [shape: f32[4,256], index: 3, kind: input, shape index: {}]   ;;  %s1009_s4 = inlined_call_operand.hbm [shape: f32[8,512], index: 4, kind: output, shape index: {}]  }
   0x1   :  { %11 = vsyncpa [#allocation4 + $0x1], 0 }
   0x2   :  { %12 = vsyncpa [#allocation5], 0 }
   0x3   :  { %14 = vsyncpa [#allocation5 + $0x1], 0  ;;  %s746_s15 = smov 0   ;;  %s748_s16 = smov 0  }
   0x4   :  { %s750_s17 = smov 0   ;;  %s752_s18 = smov 0  }
   0x5 LB: > { %s767_s19 = sadd.s32 4294967295, %s712_s18   ;;  %s545_s20 = sadd.s32 4294967294, %s712_s18   ;;  %s712_s18 = sphi %s752_s18, %s1024_s18   ;;  %s708_s17 = sphi %s750_s17, %s1023_s17   ;;  %s704_s16 = sphi %s748_s16, %s1022_s16   ;;  %s700_s15 = sphi %s746_s15, %s1021_s15  }
   0x6   : > { %s771_s21 = sadd.s32 1, %s712_s18   ;;  %s27_s22 = sadd.s32 1, %s708_s17 }
   0x7   : > { %s24_s23 = ssub.s32 %s712_s18, %s771_s21  ;;  %p34_p0 = scmp.ne.s32.totalorder %s708_s17, %s704_s16 }
   0x8   : > { %p25_p1 = scmp.eq.s32.totalorder %s24_s23, 0  ;;  %p35_p2 = scmp.eq.s32.totalorder %s712_s18, 0 }
   0x9   : > { %p40_p3 = scmp.ne.s32.totalorder %s704_s16, %s700_s15  ;;  %p41_p4 = scmp.eq.s32.totalorder %s767_s19, 0 }
   0xa   : > { %s783_s24 = scalar_select %p25_p1, %s708_s17, %s27_s22  }
   0xb   : > { %p785_p5 = por %p35_p2, %p34_p0  ;;  %p789_p6 = por %p41_p4, %p40_p3 }
   0xc   : > { %p127_p7 = scmp.eq.s32.totalorder %s767_s19, 1  ;;  %p133_p8 = scmp.eq.s32.totalorder %s545_s20, 1 }
   0xd   : > { %p575_p10 = scmp.lt.s32.totalorder %s712_s18, 2  ;;  %s162_s29 = sand.u32 1, %s708_s17  }
   0xe   : > { %p796_p11 = por %p127_p7, %p34_p0  ;;  %p800_p12 = por %p133_p8, %p40_p3 }
   0xf   : > { %s561_s30 = sshll.u32 %s712_s18, 7  ;;  %s548_s5 = sshll.u32 %s162_s29, 3 }
  0x10   : > { %s1013_s27 = scalar_select %p796_p11, 1, 0 }
  0x11   : > { %s1014_s28 = scalar_select %p800_p12, 1, 0 }
  0x12   : > { %s809_s8 = scalar_lea.hbm %s1005_s0, %s561_s30  ;;  %s166_s9 = scalar_lea.vmem [#allocation3], %s548_s5 }
  0x13   : > { %s174_s10 = sshll.u32 %s166_s9, 4  ;;  %p813_p13 = pnand %p575_p10, %p785_p5  ;;  %s817_s10 = int_to_ptr.vmem [resolvable:$true] %s174_s10 }
  0x14   : > { %s163_s12 = scalar_lea.sflag [#allocation4], %s162_s29  ;;  %s616_s13 = scalar_lea.hbm %s809_s8, 128 }
  0x15   : > { %p617_p2 = scmp.ne.s32.totalorder %s809_s8, %s616_s13  ;;  %p618_p3 = pneg %p813_p13 }
  0x16   : > { %s621_s22 = scalar_lea.hbm %s1005_s0, 256  ;;  %p622_p5 = scmp.lt.u32.totalorder %s809_s8, %s1005_s0 }
  0x17   : > { %p619_p4 = pnand %p618_p3, %p617_p2  ;;  %p623_p8 = scmp.lt.u32.totalorder %s621_s22, %s616_s13 }
  0x18   : > { %p625_p9 = scmp.lt.u32.totalorder %s616_s13, %s809_s8 }
  0x19   : > { %p620_p7 = pneg %p619_p4  ;;  %p624_p10 = por %p623_p8, %p622_p5 }
  0x1b   : > { %p626_p0 = por %p625_p9, %p624_p10 }
  0x1d   : > { %p627_p1 = pnand %p626_p0, %p620_p7 }
  0x1f   : > { %630 = shalt.err (!%p627_p1)
}
  0x20   : > { %s631_s29 = scalar_lea.vmem %s817_s10, 128  ;;  %s714_s30 = smov [#allocation3]  }
  0x21   : > { %p632_p2 = scmp.ne.s32.totalorder %s817_s10, %s631_s29  ;;  %s636_s5 = sshll.u32 %s714_s30, 4  ;;  %s637_s5 = int_to_ptr.vmem [resolvable:$false] %s636_s5 }
  0x22   : > { %s638_s6 = scalar_lea.vmem %s637_s5, 256  ;;  %p639_p11 = scmp.lt.s32.totalorder %s817_s10, %s637_s5 }
  0x23   : > { %p634_p4 = pnand %p632_p2, %p618_p3  ;;  %p640_p5 = scmp.lt.s32.totalorder %s638_s6, %s631_s29 }
  0x25   : > { %p635_p12 = pneg %p634_p4  ;;  %p641_p8 = por %p640_p5, %p639_p11 }
  0x27   : > { %p642_p9 = pnand %p641_p8, %p635_p12 }
  0x29   : > { %645 = shalt.err (!%p642_p9)
}
  0x2a   : > { %570 = dma.hbm_to_vmem [thread:$0]  (!%p813_p13), %s809_s8, 128, %s817_s10, %s163_s12  }
  0x2b   : > { %p1016_p0 = scmp.lt.s32.totalorder %s712_s18, 3  ;;  %p1017_p1 = scmp.ge.s32.totalorder %s712_s18, 1 }
  0x2d   : > { %p180_p3 = pnand %p1017_p1, %p1016_p0 }
  0x2e   : > { %s851_s7 = sand.u32 (!%p180_p3), 1, %s704_s16  }
  0x2f   : > { %183 = sbr.rel (%p180_p3) target bundleno = 567 (0x237), region = 36  ;;  %s552_s9 = sshll.u32 (!%p180_p3), %s851_s7, 3 }
  0x30   : > { %s186_s13 = scalar_lea.sflag (!%p180_p3), [#allocation4], %s851_s7  ;;  %s189_s14 = scalar_lea.vmem (!%p180_p3), [#allocation3], %s552_s9 }
  0x36   : > { %691 = dma.done.wait (%p789_p6), %s186_s13, 128  }
  0x37   : > { %693 = vsyncadd (%p789_p6), %s186_s13, 4294967168  ;;  %v859_v0 = vld [vmem:[%s189_s14] sm:$0xff]  ;;  %s715_s8 = smov 112   ;;  %s716_s10 = smov 16   ;;  %v228_v2 = vlaneseq  ;;  %v719_v62 = vmov 0   ;;  %vm410_vm4 = vcmask 1045504  }
  0x38   : > { %254 = vrot.lane.b32.xlu1 %v859_v0, %s715_s8  ;;  %222 = vst [vmem:[#allocation2] sm:$0xf] %v859_v0  ;;  %224 = vrot.lane.b32.xlu0 %v859_v0, %s716_s10  ;;  %v868_v1 = vcombine.high %v859_v0, %v859_v0  ;;  %s717_s26 = smov 1   ;;  %s718_s11 = smov 127   ;;  %v218_v8 = vld [vmem:[%s1008_s3] sm:$0xff]  ;;  %vm406_vm5 = vcmask 97280  }
  0x39   : > { %v235_v3 = vshrl.u32 %v228_v2, 7  ;;  %v886_v9 = vand.u32 127, %v228_v2  ;;  %449 = vmatprep.mubr.bf16.mxu0 %v719_v62  ;;  %614 = vset.pattern.permute.xlu0 %v719_v62  ;;  %v400_v63 = vld [vmem:[%s1007_s2] sm:$0xff]  ;;  %s553_s30 = sshll.u32 %s851_s7, 4  ;;  %s562_s5 = sshll.u32 %s767_s19, 8 }
  0x3a   : > { %223 = vst [vmem:[#allocation2 + $0x8] sm:$0xf] %v868_v1  ;;  %s213_s6 = scalar_lea.vmem [#allocation6], %s553_s30  ;;  %s461_s19 = scalar_lea.sflag [#allocation5], %s851_s7 }
  0x3b   : > { %v263_v4 = vsub.s32 1, %v235_v3  ;;  %v267_v5 = vsub.s32 5, %v235_v3  ;;  %v236_v6 = vsub.s32 0, %v235_v3  ;;  %v240_v7 = vsub.s32 4, %v235_v3  ;;  %s475_s9 = sshll.u32 %s213_s6, 4  ;;  %p1018_p11 = scmp.ne.s32.totalorder %s1013_s27, 0  ;;  %s963_s9 = int_to_ptr.vmem [resolvable:$true] %s475_s9 }
  0x3c   : > { %283 = vrot.lane.b32.xlu0 %v859_v0, %s717_s26  ;;  %256 = vrot.lane.b32.xlu1 %v868_v1, %s715_s8  ;;  %v292_v12 = vsub.s32 2, %v235_v3  ;;  %v296_v13 = vsub.s32 6, %v235_v3  ;;  %v321_v14 = vsub.s32 3, %v235_v3  ;;  %v325_v15 = vsub.s32 7, %v235_v3 }
  0x3d   : > { %v264_v16 = vrot.slane %v218_v8, %v263_v4  ;;  %v268_v17 = vrot.slane %v218_v8, %v267_v5  ;;  %v237_v18 = vrot.slane %v218_v8, %v236_v6  ;;  %v241_v19 = vrot.slane %v218_v8, %v240_v7 }
  0x3e   : > { %vm258_vm0 = vcmp.lt.s32.totalorder %v886_v9, 112  ;;  %v293_v22 = vrot.slane %v218_v8, %v292_v12  ;;  %v297_v23 = vrot.slane %v218_v8, %v296_v13  ;;  %v322_v24 = vrot.slane %v218_v8, %v321_v14 }
  0x3f   : > { %v326_v25 = vrot.slane %v218_v8, %v325_v15  ;;  %vm287_vm1 = vcmp.lt.s32.totalorder %v886_v9, 1  ;;  %vm230_vm2 = vcmp.lt.s32.totalorder %v886_v9, 16  ;;  %v274_v26 = vrot.slane %v264_v16, %v263_v4 }
  0x40   : > { %285 = vrot.lane.b32.xlu1 %v868_v1, %s717_s26  ;;  %226 = vrot.lane.b32.xlu0 %v868_v1, %s716_s10  ;;  %v278_v27 = vrot.slane %v268_v17, %v263_v4  ;;  %v891_v28 = vrot.slane %v237_v18, %v236_v6  ;;  %v893_v29 = vrot.slane %v241_v19, %v236_v6  ;;  %vm316_vm3 = vcmp.lt.s32.totalorder %v886_v9, 127 }
  0x41   : > { %v303_v32 = vrot.slane %v293_v22, %v292_v12  ;;  %v307_v33 = vrot.slane %v297_v23, %v292_v12  ;;  %v900_v36 = vrot.slane %v322_v24, %v321_v14  ;;  %v902_v37 = vrot.slane %v326_v25, %v321_v14 }
  0x44   : > { %314 = vrot.lane.b32.xlu1 %v868_v1, %s718_s11  ;;  %312 = vrot.lane.b32.xlu0 %v859_v0, %s718_s11 }
  0xaa   : > { %v255_v10 = vpop.permute.xlu1 %254  ;;  %v225_v11 = vpop.permute.xlu0 %224 }
  0xae   : > { %v284_v20 = vpop.permute.xlu0 %283  ;;  %v257_v21 = vpop.permute.xlu1 %256 }
  0xaf   : > { %v259_v30 = vsel %vm258_vm0, %v255_v10, %v257_v21  ;;  %v260_v31 = vsel %vm258_vm0, %v257_v21, %v255_v10 }
  0xb0   : > { %v279_v42 = vmul.f32 %v274_v26, %v259_v30  ;;  %v280_v43 = vmul.f32 %v278_v27, %v260_v31 }
  0xb2   : > { %v286_v34 = vpop.permute.xlu1 %285  ;;  %v227_v35 = vpop.permute.xlu0 %226 }
  0xb3   : > { %v288_v38 = vsel %vm287_vm1, %v284_v20, %v286_v34  ;;  %v289_v39 = vsel %vm287_vm1, %v286_v34, %v284_v20  ;;  %v231_v40 = vsel %vm230_vm2, %v225_v11, %v227_v35  ;;  %v232_v41 = vsel %vm230_vm2, %v227_v35, %v225_v11 }
  0xb4   : > { %v252_v44 = vmul.f32 %v891_v28, %v232_v41  ;;  %v253_v45 = vmul.f32 %v893_v29, %v231_v40  ;;  %v308_v46 = vmul.f32 %v303_v32, %v289_v39  ;;  %v309_v47 = vmul.f32 %v307_v33, %v288_v38 }
  0xb6   : > { %v281_v48 = vadd.f32 %v279_v42, %v252_v44  ;;  %v282_v49 = vadd.f32 %v280_v43, %v253_v45  ;;  %v315_v50 = vpop.permute.xlu1 %314  ;;  %v313_v51 = vpop.permute.xlu0 %312 }
  0xb7   : > { %v317_v52 = vsel %vm316_vm3, %v313_v51, %v315_v50  ;;  %v318_v53 = vsel %vm316_vm3, %v315_v50, %v313_v51 }
  0xb8   : > { %v310_v54 = vadd.f32 %v308_v46, %v281_v48  ;;  %v311_v55 = vadd.f32 %v309_v47, %v282_v49  ;;  %v337_v56 = vmul.f32 %v900_v36, %v317_v52  ;;  %v338_v57 = vmul.f32 %v902_v37, %v318_v53 }
  0xba   : > { %v339_v58 = vadd.f32 %v337_v56, %v310_v54  ;;  %v340_v59 = vadd.f32 %v338_v57, %v311_v55 }
  0xbc   : > { %v343_v60 = vrot.slane %v339_v58, 4  ;;  %v344_v61 = vrot.slane %v340_v59, 4  ;;  %351 = vrot.lane.b32.xlu1 %v340_v59, %s716_s10  ;;  %349 = vrot.lane.b32.xlu0 %v339_v58, %s716_s10  ;;  %s646_s10 = scalar_lea.vmem %s963_s9, 256 }
  0xbd   : > { %p647_p6 = scmp.ne.s32.totalorder %s963_s9, %s646_s10 }
  0xbe   : > { %347 = vst [vmem:[#allocation2] sm:$0xf0] %v343_v60  ;;  %348 = vst [vmem:[#allocation2 + $0x8] sm:$0xf0] %v344_v61 }
  0xbf   : > { %p648_p12 = pnand %p647_p6, %p1018_p11 }
  0xc0   : > { %359 = vrot.lane.b32.xlu1 %v340_v59, %s715_s8  ;;  %357 = vrot.lane.b32.xlu0 %v339_v58, %s715_s8  ;;  %s961_s8 = scalar_lea.hbm %s1009_s4, %s562_s5 }
  0xc1   : > { %p649_p13 = pneg %p648_p12 }
  0xc4   : > { %369 = vrot.lane.b32.xlu1 %v340_v59, %s717_s26  ;;  %367 = vrot.lane.b32.xlu0 %v339_v58, %s717_s26  ;;  %s720_s26 = smov [#allocation6]  }
  0xc5   : > { %v394_v9 = vld [vmem:[#allocation2 + $0x8] sm:$0xff]  ;;  %v393_v40 = vld [vmem:[#allocation2] sm:$0xff] }
  0xc8   : > { %379 = vrot.lane.b32.xlu1 %v340_v59, %s718_s11  ;;  %377 = vrot.lane.b32.xlu0 %v339_v58, %s718_s11  ;;  %s650_s11 = sshll.u32 %s720_s26, 4  ;;  %s651_s11 = int_to_ptr.vmem [resolvable:$false] %s650_s11 }
  0xc9   : > { %s652_s12 = scalar_lea.vmem %s651_s11, 512  ;;  %p653_p7 = scmp.lt.s32.totalorder %s963_s9, %s651_s11 }
  0xca   : > { %p654_p10 = scmp.lt.s32.totalorder %s652_s12, %s646_s10 }
  0xcc   : > { %403 = vperm.xlu0 %614, %v400_v63   ;;  %p655_p2 = por %p654_p10, %p653_p7 }
  0xce   : > { %p656_p4 = pnand %p655_p2, %p649_p13 }
 0x12e   : > { %v352_v2 = vpop.permute.xlu1 %351  ;;  %v350_v3 = vpop.permute.xlu0 %349 }
 0x12f   : > { %v353_v8 = vsel %vm230_vm2, %v350_v3, %v352_v2  ;;  %v354_v10 = vsel %vm230_vm2, %v352_v2, %v350_v3 }
 0x130   : > { %v355_v17 = vmul.f32 %v354_v10, %v891_v28  ;;  %v356_v18 = vmul.f32 %v353_v8, %v893_v29 }
 0x132   : > { %v360_v4 = vpop.permute.xlu1 %359  ;;  %v358_v5 = vpop.permute.xlu0 %357 }
 0x133   : > { %v361_v6 = vsel %vm258_vm0, %v358_v5, %v360_v4  ;;  %v362_v7 = vsel %vm258_vm0, %v360_v4, %v358_v5 }
 0x134   : > { %v363_v11 = vmul.f32 %v361_v6, %v274_v26  ;;  %v364_v12 = vmul.f32 %v362_v7, %v278_v27 }
 0x136   : > { %v370_v13 = vpop.permute.xlu1 %369  ;;  %v368_v14 = vpop.permute.xlu0 %367  ;;  %v365_v21 = vadd.f32 %v363_v11, %v355_v17  ;;  %v366_v22 = vadd.f32 %v364_v12, %v356_v18 }
 0x137   : > { %v371_v15 = vsel %vm287_vm1, %v368_v14, %v370_v13  ;;  %v372_v16 = vsel %vm287_vm1, %v370_v13, %v368_v14 }
 0x138   : > { %v373_v19 = vmul.f32 %v372_v16, %v303_v32  ;;  %v374_v20 = vmul.f32 %v371_v15, %v307_v33 }
 0x13a   : > { %v380_v23 = vpop.permute.xlu1 %379  ;;  %v378_v24 = vpop.permute.xlu0 %377  ;;  %v375_v27 = vadd.f32 %v373_v19, %v365_v21  ;;  %v376_v30 = vadd.f32 %v374_v20, %v366_v22 }
 0x13b   : > { %v381_v25 = vsel %vm316_vm3, %v378_v24, %v380_v23  ;;  %v382_v26 = vsel %vm316_vm3, %v380_v23, %v378_v24 }
 0x13c   : > { %v383_v31 = vmul.f32 %v381_v25, %v900_v36  ;;  %v384_v28 = vmul.f32 %v382_v26, %v902_v37 }
 0x13e   : > { %v385_v34 = vadd.f32 %v383_v31, %v375_v27  ;;  %v386_v29 = vadd.f32 %v384_v28, %v376_v30 }
 0x140   : > { %v387_v32 = vmul.f32 2.0, %v385_v34  ;;  %v388_v33 = vmul.f32 2.0, %v386_v29 }
 0x142   : > { %v389_v35 = vsub.f32 %v387_v32, %v859_v0  ;;  %v390_v38 = vsub.f32 %v388_v33, %v868_v1  ;;  %v399_v0 = vld [vmem:[%s1006_s1] sm:$0xf] }
 0x144   : > { %391 = vst [vmem:[#allocation2 + $0x10] sm:$0xf] %v389_v35  ;;  %392 = vst [vmem:[#allocation2 + $0x18] sm:$0xf] %v390_v38 }
 0x14b   : > { %v396_v39 = vld [vmem:[#allocation2 + $0x18] sm:$0xf]  ;;  %v395_v41 = vld [vmem:[#allocation2 + $0x10] sm:$0xf]  ;;  %v404_v1 = vpop.permute.xlu0 %403 }
 0x14c   : > { %v398_v36 = vpack.c.bf16 %v396_v39, %v394_v9  ;;  %v397_v42 = vpack.c.bf16 %v395_v41, %v393_v40 }
 0x14e   : > { %554 = vmatprep.subr.msk.bf16.mxu0 %vm410_vm4, %v398_v36  ;;  %v412_v37 = vsel %vm410_vm4, %v397_v42, 0 }
 0x14f   : > { %418 = vmatpush1.bf16.msra.mxu0 %v412_v37 }
 0x152   : > { %555 = vmatmul.mubr.msk.bf16.vlgmr.msra.gmra.mrb[0].mxu0 %vm406_vm5, %v399_v0 }
 0x225   : > { %v451_v43 = vpop.f32.mrb[0].mxu0 }
 0x226   : > { %v452_v44 = vadd.f32 %v451_v43, %v404_v1  ;;  %v453_v45 = vpop.f32.mrb[1].mxu0 }
 0x227   : > { %v454_v46 = vadd.f32 %v453_v45, %v404_v1  ;;  %v455_v47 = vpop.f32.mrb[2].mxu0 }
 0x228   : > { %458 = vst [vmem:[%s213_s6] sm:$0xff] %v452_v44  ;;  %v456_v48 = vpop.f32.mrb[3].mxu0 }
 0x229   : > { %459 = vst [vmem:[%s213_s6 + $0x8] sm:$0xff] %v454_v46 }
 0x22a   : > { %659 = shalt.err (!%p656_p4)
}
 0x22b   : > { %s660_s7 = scalar_lea.hbm %s961_s8, 256  ;;  %s664_s23 = scalar_lea.hbm %s1009_s4, 512 }
 0x22c   : > { %p661_p5 = scmp.ne.s32.totalorder %s961_s8, %s660_s7  ;;  %p665_p0 = scmp.lt.u32.totalorder %s961_s8, %s1009_s4 }
 0x22d   : > { %p666_p1 = scmp.lt.u32.totalorder %s664_s23, %s660_s7  ;;  %p668_p6 = scmp.lt.u32.totalorder %s660_s7, %s961_s8 }
 0x22e   : > { %p662_p8 = pnand %p661_p5, %p1018_p11 }
 0x22f   : > { %p667_p3 = por %p666_p1, %p665_p0 }
 0x230   : > { %p663_p9 = pneg %p662_p8 }
 0x231   : > { %p669_p12 = por %p668_p6, %p667_p3 }
 0x233   : > { %p670_p13 = pnand %p669_p12, %p663_p9 }
 0x235   : > { %673 = shalt.err (!%p670_p13)
}
 0x236   : > { %565 = dma.vmem_to_hbm [thread:$0]  (%p1018_p11), %s963_s9, 256, %s961_s8, %s461_s19  }
 0x237 PF: > { %s487_s30 = sand.u32 1, %s700_s15   ;;  %p1019_p7 = scmp.ne.s32.totalorder %s1014_s28, 0 }
 0x238   : > { %p1020_p10 = scmp.ge.s32.totalorder %s712_s18, 2  ;;  %s488_s5 = scalar_lea.sflag [#allocation5], %s487_s30 }
 0x23a   : > { %p572_p2 = pnand %p1020_p10, %p1019_p7 }
 0x23c   : > { %695 = dma.done.wait (!%p572_p2), %s488_s5, 256  }
 0x23d   : > { %697 = vsyncadd (!%p572_p2), %s488_s5, 4294967040  ;;  %p17_p4 = scmp.ge.s32.totalorder %s771_s21, 4   ;;  %s1021_s15 = smov %s704_s16 }
 0x23e   : > { %s1022_s16 = smov %s708_s17  ;;  %s1023_s17 = smov %s783_s24 }
 0x23f   : > { %s1024_s18 = smov %s771_s21  ;;  %19 = sbr.rel (!%p17_p4) target bundleno = 5 (0x5), region = 81 }
 0x246   :  { %493 = vsyncpa [#allocation4], 1 }
 0x247   :  { %495 = vsyncpa [#allocation4 + $0x1], 1 }
 0x248   :  { %496 = vsyncpa [#allocation5], 1 }
 0x249   :  { %498 = vsyncpa [#allocation5 + $0x1], 1 }

</bundles_post_ra>
